<compile_context>
chip_gen: v7x
topology: tpu7x:2x2x1
jax: 0.10.0
libtpu: 0.0.40
codegen_flags: <defaults>
</compile_context>

<pallas_src>
import jax
import jax.numpy as jnp
from jax.experimental import pallas as pl
from jax.experimental.pallas import tpu as pltpu


def fm_kernel(emb_ref, lr_ref, out_ref):
    """One batch tile: emb_ref [TB, F, D], lr_ref [TB, 1], out_ref [TB, 1]."""
    emb = emb_ref[...].astype(jnp.float32)                    # f32 accumulation
    sum_f = jnp.sum(emb, axis=1)                              # [TB, D]
    sum_sq = jnp.sum(emb * emb, axis=1)                       # [TB, D]
    dot_sum = 0.5 * jnp.sum(sum_f * sum_f - sum_sq,
                            axis=-1, keepdims=True)           # [TB, 1]
    out_ref[...] = (dot_sum + lr_ref[...]).astype(out_ref.dtype)


def _round_up(x, m):
    return ((x + m - 1) // m) * m


def _pick_batch_tile(B, F, D, itemsize,
                     target_block_bytes=4 << 20, tb_cap=4096):
    # ~4 MiB embedding block per grid step; double-buffered stays well under
    # v7x's 64 MiB VMEM (and the 32 MiB default scoped limit), while keeping
    # tiles large enough to amortize per-step overhead on v5e/v6e as well.
    per_row = max(1, F * D * itemsize)
    tb = min(tb_cap, max(8, target_block_bytes // per_row))
    tb = min(tb, _round_up(B, 8))          # don't pad far past the real batch
    return max(8, (tb // 8) * 8)           # sublane-aligned (TB, 1) blocks


def fm_layer_forward(X, feature_emb, lr_table, bias, *, batch_tile=None):
    """X: [B, F] int32; feature_emb: [B, F, D] (f32 or bf16);
    lr_table: [vocab, 1] f32; bias: [1] f32.  Returns [B, 1] f32."""
    B, F, D = feature_emb.shape
    itemsize = jnp.dtype(feature_emb.dtype).itemsize

    # LR branch: data-dependent embedding gather stays in XLA, pre-reduced to
    # [B, 1] so the kernel carries no [B, F] input stream or SMEM bias ref.
    lr_vec = (jnp.sum(lr_table[X.reshape(-1)].reshape(B, F),
                      axis=1, keepdims=True) + bias[0]).astype(jnp.float32)

    TB = batch_tile if batch_tile is not None else _pick_batch_tile(
        B, F, D, itemsize)
    TB = max(8, (TB // 8) * 8)
    B_pad = _round_up(B, TB)
    if B_pad != B:
        feature_emb = jnp.pad(feature_emb, ((0, B_pad - B), (0, 0), (0, 0)))
        lr_vec = jnp.pad(lr_vec, ((0, B_pad - B), (0, 0)))

    grid = (B_pad // TB,)

    emb_block_bytes = TB * F * D * itemsize
    io_block_bytes = 2 * TB * 4
    vmem_limit = int(min(32 * 1024 * 1024,
                         max(8 * 1024 * 1024,
                             4 * (emb_block_bytes + io_block_bytes))))

    cost = pl.CostEstimate(
        flops=4 * B_pad * F * D,
        transcendentals=0,
        bytes_accessed=B_pad * F * D * itemsize + 2 * B_pad * 4,
    )

    out = pl.pallas_call(
        fm_kernel,
        out_shape=jax.ShapeDtypeStruct((B_pad, 1), jnp.float32),
        grid=grid,
        in_specs=[
            pl.BlockSpec((TB, F, D), lambda i: (i, 0, 0)),
            pl.BlockSpec((TB, 1), lambda i: (i, 0)),
        ],
        out_specs=pl.BlockSpec((TB, 1), lambda i: (i, 0)),
        compiler_params=pltpu.CompilerParams(
            dimension_semantics=("parallel",),   # v7x: shard grid over 2 TCs
            vmem_limit_bytes=vmem_limit,
        ),
        cost_estimate=cost,
    )(feature_emb, lr_vec)

    return out[:B]


def fm_layer_reference(X, feature_emb, lr_table, bias):
    B, F = X.shape
    lr_out = jnp.sum(lr_table[X.reshape(-1)].reshape(B, F),
                     axis=1, keepdims=True) + bias[0]
    emb = feature_emb.astype(jnp.float32)
    sum_f = jnp.sum(emb, axis=1)
    sum_sq = jnp.sum(emb * emb, axis=1)
    dot_sum = 0.5 * jnp.sum(sum_f ** 2 - sum_sq, axis=-1, keepdims=True)
    return dot_sum + lr_out


if __name__ == "__main__":
    B, F, D, VOCAB = 64, 8, 32, 100   # batch, num_fields, embedding_dim, vocab

    key = jax.random.PRNGKey(0)
    k_x, k_emb, k_lr = jax.random.split(key, 3)

    X = jax.random.randint(k_x, (B, F), 0, VOCAB, dtype=jnp.int32)
    feature_emb = jax.random.normal(k_emb, (B, F, D), dtype=jnp.float32) * 0.1
    lr_table = jax.random.normal(k_lr, (VOCAB, 1), dtype=jnp.float32) * 0.01
    bias = jnp.zeros((1,), dtype=jnp.float32)  # nn.Parameter(torch.zeros(1))

    # f32 path; explicit small batch tile so the demo exercises a multi-step
    # pipelined grid (64 rows / TB=16 -> 4 grid steps).
    out = fm_layer_forward(X, feature_emb, lr_table, bias, batch_tile=16)
    out = jax.block_until_ready(out)
    ref = fm_layer_reference(X, feature_emb, lr_table, bias)
    assert out.shape == (B, 1)
    assert jnp.allclose(out, ref, atol=1e-5, rtol=1e-5), (out, ref)

    # bf16 embeddings (half the HBM traffic), auto batch tile, f32 accumulation.
    emb_bf16 = feature_emb.astype(jnp.bfloat16)
    out_bf16 = jax.block_until_ready(
        fm_layer_forward(X, emb_bf16, lr_table, bias))
    ref_bf16 = fm_layer_reference(X, emb_bf16, lr_table, bias)
    assert jnp.allclose(out_bf16, ref_bf16, atol=1e-3, rtol=1e-3), (out_bf16,
                                                                    ref_bf16)

    print("KERNEL_OK")
</pallas_src>

<mosaic_0001>
module attributes {stable_mosaic.version = 11 : i64} {
  func.func @fm_kernel(%arg0: i32, %arg1: memref<16x8x32xf32, #tpu.memory_space<vmem>>, %arg2: memref<16x1xf32, #tpu.memory_space<vmem>>, %arg3: memref<16x1xf32, #tpu.memory_space<vmem>>) attributes {dimension_semantics = [#tpu.dimension_semantics<parallel>], iteration_bounds = array<i64: 4>, scalar_prefetch = 0 : i64, scratch_operands = 0 : i64, tpu.core_type = #tpu.core_type<tc>, window_params = [{transform_indices = @transform_0, window_bounds = array<i64: 16, 8, 32>}, {transform_indices = @transform_1, window_bounds = array<i64: 16, 1>}, {transform_indices = @transform_2, window_bounds = array<i64: 16, 1>}]} {
    %c0 = arith.constant 0 : index
    %c0_0 = arith.constant 0 : index
    %c0_1 = arith.constant 0 : index
    %0 = vector.load %arg1[%c0, %c0_0, %c0_1] : memref<16x8x32xf32, #tpu.memory_space<vmem>>, vector<16x8x32xf32>
    %cst = arith.constant dense<0.000000e+00> : vector<16x32xf32>
    %1 = vector.multi_reduction <add>, %0, %cst [1] : vector<16x8x32xf32> to vector<16x32xf32>
    %2 = arith.mulf %0, %0 : vector<16x8x32xf32>
    %cst_2 = arith.constant dense<0.000000e+00> : vector<16x32xf32>
    %3 = vector.multi_reduction <add>, %2, %cst_2 [1] : vector<16x8x32xf32> to vector<16x32xf32>
    %4 = arith.mulf %1, %1 : vector<16x32xf32>
    %5 = arith.subf %4, %3 : vector<16x32xf32>
    %cst_3 = arith.constant dense<0.000000e+00> : vector<16xf32>
    %6 = vector.multi_reduction <add>, %5, %cst_3 [1] : vector<16x32xf32> to vector<16xf32>
    %7 = vector.shape_cast %6 : vector<16xf32> to vector<16x1xf32>
    %cst_4 = arith.constant 5.000000e-01 : f32
    %8 = vector.broadcast %cst_4 : f32 to vector<16x1xf32>
    %9 = arith.mulf %8, %7 : vector<16x1xf32>
    %c0_5 = arith.constant 0 : index
    %c0_6 = arith.constant 0 : index
    %10 = vector.load %arg2[%c0_5, %c0_6] : memref<16x1xf32, #tpu.memory_space<vmem>>, vector<16x1xf32>
    %11 = arith.addf %9, %10 : vector<16x1xf32>
    %c0_7 = arith.constant 0 : index
    %c0_8 = arith.constant 0 : index
    %12 = vector.load %arg3[%c0_7, %c0_8] : memref<16x1xf32, #tpu.memory_space<vmem>>, vector<16x1xf32>
    tpu.vector_store %arg3[%c0_7, %c0_8], %11 {strides = array<i32>} : memref<16x1xf32, #tpu.memory_space<vmem>>, vector<16x1xf32>,
    return
  }
  func.func @transform_0(%arg0: i32) -> (i32, i32, i32) {
    %c0_i32 = arith.constant 0 : i32
    %c0_i32_0 = arith.constant 0 : i32
    %c0_i32_1 = arith.constant 0 : i32
    return %arg0, %c0_i32, %c0_i32_0 : i32, i32, i32
  }
  func.func @transform_1(%arg0: i32) -> (i32, i32) {
    %c0_i32 = arith.constant 0 : i32
    %c0_i32_0 = arith.constant 0 : i32
    return %arg0, %c0_i32 : i32, i32
  }
  func.func @transform_2(%arg0: i32) -> (i32, i32) {
    %c0_i32 = arith.constant 0 : i32
    %c0_i32_0 = arith.constant 0 : i32
    return %arg0, %c0_i32 : i32, i32
  }
}

</mosaic_0001>

<bundles_post_ra>
// kernel: tpu_custom_call.1
= control target key start
LH: loop header
LB: loop body
LE: loop exit
PB: predicated region body
PF: predicated region fallthrough
CT: control target
= control target key end

     0   :  { %s624_s9 = smov 0   ;;  %s795_s0 = inlined_call_operand.vmem [shape: f32[64,8,32], index: 0, kind: input, shape index: {}]   ;;  %s796_s1 = inlined_call_operand.vmem [shape: f32[64,1], index: 1, kind: input, shape index: {}]   ;;  %s797_s2 = inlined_call_operand.vmem [shape: f32[64,1], index: 2, kind: output, shape index: {}]  }
   0x1 LB: > { %s580_s10 = sadd.s32 4294967295, %s607_s9   ;;  %p584_p0 = scmp.ge.s32.totalorder %s607_s9, 1  ;;  %s607_s9 = sphi %s624_s9, %s12_s9  }
   0x2   : > { %p124_p1 = scmp.lt.s32.totalorder %s607_s9, 5 }
   0x4   : > { %p125_p2 = pnand %p584_p0, %p124_p1 }
   0x5   : > { %s585_s11 = sshll.u32 (!%p125_p2), %s580_s10, 4  ;;  %vm185_vm0 = vcmask (!%p125_p2), 261120   ;;  %vm474_vm1 = vcmask (!%p125_p2), 1041409   ;;  %vm476_vm2 = vcmask (!%p125_p2), 1042434   ;;  %vm478_vm3 = vcmask (!%p125_p2), 1043459   ;;  %s587_s16 = sshll.u32 (!%p125_p2), %s580_s10, 1 }
   0x6   : > { %128 = sbr.rel (%p125_p2) target bundleno = 241 (0xf1), region = 28  ;;  %p152_p3 = scmp.lt.s32.totalorder (!%p125_p2), %s585_s11, 63  ;;  %vm480_vm4 = vcmask (!%p125_p2), 1044484   ;;  %vm482_vm5 = vcmask (!%p125_p2), 1045509   ;;  %vm484_vm6 = vcmask (!%p125_p2), 1046534   ;;  %vm486_vm7 = vcmask (!%p125_p2), 1047559  }
   0x7   : > { %p158_p4 = scmp.lt.s32.totalorder (!%p125_p2), %s587_s16, 7  ;;  %vm509_vm8 = vcmask (!%p125_p2), 7168  }
   0xd   : > { %s799_s11 = smov (!%p152_p3, %s585_s11), 63  ;;  %s801_s16 = smov (!%p158_p4, %s587_s16), 7 }
   0xe   : > { %s586_s12 = sshll.u32 %s799_s11, 3  ;;  %s588_s17 = sshll.u32 %s801_s16, 3 }
   0xf   : > { %s637_s15 = scalar_lea.vmem %s795_s0, %s586_s12  ;;  %s161_s20 = scalar_lea.vmem %s796_s1, %s588_s17 }
  0x10   : > { %v169_v0 = vld [vmem:[%s637_s15] sm:$0xff]  ;;  %v170_v1 = vld [vmem:[%s637_s15 + $0x8] sm:$0xff]  ;;  %v171_v2 = vld [vmem:[%s637_s15 + $0x10] sm:$0xff]  ;;  %s167_s23 = scalar_lea.vmem %s797_s2, %s588_s17 }
  0x11   : > { %v172_v3 = vld [vmem:[%s637_s15 + $0x18] sm:$0xff]  ;;  %v173_v4 = vld [vmem:[%s637_s15 + $0x20] sm:$0xff]  ;;  %v174_v5 = vld [vmem:[%s637_s15 + $0x28] sm:$0xff]  ;;  %v186_v6 = vsel %vm185_vm0, %v169_v0, 0.0  ;;  %v193_v7 = vsel %vm185_vm0, %v170_v1, 0.0  ;;  %v200_v8 = vsel %vm185_vm0, %v171_v2, 0.0  ;;  %v298_v9 = vmul.f32 %v169_v0, %v169_v0 }
  0x12   : > { %v175_v10 = vld [vmem:[%s637_s15 + $0x30] sm:$0xff]  ;;  %v176_v11 = vld [vmem:[%s637_s15 + $0x38] sm:$0xff]  ;;  %v187_v12 = vrot.slane %v186_v6, 4  ;;  %v194_v13 = vrot.slane %v193_v7, 4  ;;  %v201_v14 = vrot.slane %v200_v8, 4  ;;  %v207_v15 = vsel %vm185_vm0, %v172_v3, 0.0 }
  0x13   : > { %v208_v16 = vrot.slane %v207_v15, 4  ;;  %v214_v17 = vsel %vm185_vm0, %v173_v4, 0.0  ;;  %v221_v18 = vsel %vm185_vm0, %v174_v5, 0.0  ;;  %v228_v19 = vsel %vm185_vm0, %v175_v10, 0.0 }
  0x14   : > { %v188_v20 = vadd.f32 %v187_v12, %v186_v6  ;;  %v195_v21 = vadd.f32 %v194_v13, %v193_v7  ;;  %v202_v22 = vadd.f32 %v201_v14, %v200_v8  ;;  %v215_v23 = vrot.slane %v214_v17, 4 }
  0x15   : > { %v209_v24 = vadd.f32 %v208_v16, %v207_v15  ;;  %v222_v25 = vrot.slane %v221_v18, 4  ;;  %v229_v26 = vrot.slane %v228_v19, 4  ;;  %v235_v27 = vsel %vm185_vm0, %v176_v11, 0.0 }
  0x16   : > { %v189_v28 = vrot.slane %v188_v20, 2  ;;  %v196_v29 = vrot.slane %v195_v21, 2  ;;  %v203_v30 = vrot.slane %v202_v22, 2  ;;  %v216_v31 = vadd.f32 %v215_v23, %v214_v17 }
  0x17   : > { %v210_v32 = vrot.slane %v209_v24, 2  ;;  %v223_v33 = vadd.f32 %v222_v25, %v221_v18  ;;  %v230_v34 = vadd.f32 %v229_v26, %v228_v19  ;;  %v236_v35 = vrot.slane %v235_v27, 4 }
  0x18   : > { %v190_v36 = vadd.f32 %v189_v28, %v188_v20  ;;  %v197_v37 = vadd.f32 %v196_v29, %v195_v21  ;;  %v204_v38 = vadd.f32 %v203_v30, %v202_v22  ;;  %v217_v39 = vrot.slane %v216_v31, 2 }
  0x19   : > { %v211_v40 = vadd.f32 %v210_v32, %v209_v24  ;;  %v224_v41 = vrot.slane %v223_v33, 2  ;;  %v231_v42 = vrot.slane %v230_v34, 2  ;;  %v237_v43 = vadd.f32 %v236_v35, %v235_v27 }
  0x1a   : > { %v191_v44 = vrot.slane %v190_v36, 1  ;;  %v198_v45 = vrot.slane %v197_v37, 1  ;;  %v205_v46 = vrot.slane %v204_v38, 1  ;;  %v218_v47 = vadd.f32 %v217_v39, %v216_v31 }
  0x1b   : > { %v212_v48 = vrot.slane %v211_v40, 1  ;;  %v225_v49 = vadd.f32 %v224_v41, %v223_v33  ;;  %v232_v50 = vadd.f32 %v231_v42, %v230_v34  ;;  %v238_v51 = vrot.slane %v237_v43, 2 }
  0x1c   : > { %v655_v52 = vadd.f32 %v191_v44, %v190_v36  ;;  %v657_v53 = vadd.f32 %v198_v45, %v197_v37  ;;  %v659_v54 = vadd.f32 %v205_v46, %v204_v38  ;;  %v219_v55 = vrot.slane %v218_v47, 1 }
  0x1d   : > { %v661_v56 = vadd.f32 %v212_v48, %v211_v40  ;;  %v226_v57 = vrot.slane %v225_v49, 1  ;;  %v233_v58 = vrot.slane %v232_v50, 1  ;;  %v239_v59 = vadd.f32 %v238_v51, %v237_v43 }
  0x1e   : > { %v663_v60 = vadd.f32 %v219_v55, %v218_v47  ;;  %v299_v61 = vmul.f32 %v170_v1, %v170_v1  ;;  %v300_v62 = vmul.f32 %v171_v2, %v171_v2  ;;  %v301_v63 = vmul.f32 %v172_v3, %v172_v3 }
  0x1f   : > { %v665_v0 = vadd.f32 %v226_v57, %v225_v49  ;;  %v667_v6 = vadd.f32 %v233_v58, %v232_v50  ;;  %v240_v7 = vrot.slane %v239_v59, 1  ;;  %v302_v8 = vmul.f32 %v173_v4, %v173_v4 }
  0x20   : > { %v303_v12 = vmul.f32 %v174_v5, %v174_v5  ;;  %v304_v13 = vmul.f32 %v175_v10, %v175_v10  ;;  %v305_v14 = vmul.f32 %v176_v11, %v176_v11  ;;  %v314_v15 = vsel %vm185_vm0, %v298_v9, 0.0 }
  0x21   : > { %v670_v16 = vadd.f32 %v240_v7, %v239_v59  ;;  %v315_v17 = vrot.slane %v314_v15, 4  ;;  %v321_v18 = vsel %vm185_vm0, %v299_v61, 0.0  ;;  %v328_v1 = vsel %vm185_vm0, %v300_v62, 0.0 }
  0x22   : > { %v322_v2 = vrot.slane %v321_v18, 4  ;;  %v329_v3 = vrot.slane %v328_v1, 4  ;;  %v335_v19 = vsel %vm185_vm0, %v301_v63, 0.0  ;;  %v342_v20 = vsel %vm185_vm0, %v302_v8, 0.0 }
  0x23   : > { %v316_v21 = vadd.f32 %v315_v17, %v314_v15  ;;  %v336_v4 = vrot.slane %v335_v19, 4  ;;  %v343_v5 = vrot.slane %v342_v20, 4  ;;  %v349_v10 = vsel %vm185_vm0, %v303_v12, 0.0 }
  0x24   : > { %v323_v11 = vadd.f32 %v322_v2, %v321_v18  ;;  %v330_v9 = vadd.f32 %v329_v3, %v328_v1  ;;  %v350_v22 = vrot.slane %v349_v10, 4  ;;  %v356_v23 = vsel %vm185_vm0, %v304_v13, 0.0  ;;  %v692_v1 = vld [vmem:[%s637_s15 + $0x40] sm:$0xff] }
  0x25   : > { %v317_v24 = vrot.slane %v316_v21, 2  ;;  %v337_v25 = vadd.f32 %v336_v4, %v335_v19  ;;  %v344_v26 = vadd.f32 %v343_v5, %v342_v20  ;;  %v357_v27 = vrot.slane %v356_v23, 4  ;;  %v699_v19 = vld [vmem:[%s637_s15 + $0x48] sm:$0xff] }
  0x26   : > { %v324_v28 = vrot.slane %v323_v11, 2  ;;  %v331_v29 = vrot.slane %v330_v9, 2  ;;  %v351_v30 = vadd.f32 %v350_v22, %v349_v10  ;;  %v363_v31 = vsel %vm185_vm0, %v305_v14, 0.0 }
  0x27   : > { %v318_v32 = vadd.f32 %v317_v24, %v316_v21  ;;  %v338_v33 = vrot.slane %v337_v25, 2  ;;  %v345_v34 = vrot.slane %v344_v26, 2  ;;  %v358_v35 = vadd.f32 %v357_v27, %v356_v23  ;;  %v182_v27 = vld [vmem:[%s637_s15 + $0x68] sm:$0xff] }
  0x28   : > { %v325_v36 = vadd.f32 %v324_v28, %v323_v11  ;;  %v332_v37 = vadd.f32 %v331_v29, %v330_v9  ;;  %v352_v38 = vrot.slane %v351_v30, 2  ;;  %v364_v39 = vrot.slane %v363_v31, 4  ;;  %v705_v11 = vld [vmem:[%s637_s15 + $0x58] sm:$0xff]  ;;  %v708_v9 = vld [vmem:[%s637_s15 + $0x60] sm:$0xff] }
  0x29   : > { %v319_v40 = vrot.slane %v318_v32, 1  ;;  %v339_v41 = vadd.f32 %v338_v33, %v337_v25  ;;  %v346_v42 = vadd.f32 %v345_v34, %v344_v26  ;;  %v359_v43 = vrot.slane %v358_v35, 2 }
  0x2a   : > { %v326_v44 = vrot.slane %v325_v36, 1  ;;  %v333_v45 = vrot.slane %v332_v37, 1  ;;  %v353_v46 = vadd.f32 %v352_v38, %v351_v30  ;;  %v365_v47 = vadd.f32 %v364_v39, %v363_v31 }
  0x2b   : > { %v320_v48 = vadd.f32 %v319_v40, %v318_v32  ;;  %v340_v49 = vrot.slane %v339_v41, 1  ;;  %v347_v50 = vrot.slane %v346_v42, 1  ;;  %v360_v51 = vadd.f32 %v359_v43, %v358_v35  ;;  %v183_v43 = vld [vmem:[%s637_s15 + $0x70] sm:$0xff] }
  0x2c   : > { %v327_v55 = vadd.f32 %v326_v44, %v325_v36  ;;  %v334_v57 = vadd.f32 %v333_v45, %v332_v37  ;;  %v354_v58 = vrot.slane %v353_v46, 1  ;;  %v366_v59 = vrot.slane %v365_v47, 2 }
  0x2d   : > { %v341_v61 = vadd.f32 %v340_v49, %v339_v41  ;;  %v348_v62 = vadd.f32 %v347_v50, %v346_v42  ;;  %v361_v63 = vrot.slane %v360_v51, 1  ;;  %v426_v7 = vmul.f32 %v655_v52, %v655_v52 }
  0x2e   : > { %v355_v8 = vadd.f32 %v354_v58, %v353_v46  ;;  %v367_v12 = vadd.f32 %v366_v59, %v365_v47  ;;  %v427_v13 = vmul.f32 %v657_v53, %v657_v53  ;;  %v428_v14 = vmul.f32 %v659_v54, %v659_v54 }
  0x2f   : > { %v362_v15 = vadd.f32 %v361_v63, %v360_v51  ;;  %v429_v17 = vmul.f32 %v661_v56, %v661_v56  ;;  %v430_v18 = vmul.f32 %v663_v60, %v663_v60  ;;  %v431_v52 = vmul.f32 %v665_v0, %v665_v0  ;;  %v702_v56 = vld [vmem:[%s637_s15 + $0x50] sm:$0xff] }
  0x30   : > { %v368_v2 = vrot.slane %v367_v12, 1  ;;  %v432_v53 = vmul.f32 %v667_v6, %v667_v6  ;;  %v433_v54 = vmul.f32 %v670_v16, %v670_v16  ;;  %v442_v3 = vsub.f32 %v426_v7, %v320_v48 }
  0x31   : > { %v443_v60 = vsub.f32 %v427_v13, %v327_v55  ;;  %v444_v20 = vsub.f32 %v428_v14, %v334_v57  ;;  %v445_v21 = vsub.f32 %v429_v17, %v341_v61  ;;  %v446_v0 = vsub.f32 %v430_v18, %v348_v62  ;;  %v184_v55 = vld [vmem:[%s637_s15 + $0x78] sm:$0xff] }
  0x32   : > { %v369_v4 = vadd.f32 %v368_v2, %v367_v12  ;;  %v447_v5 = vsub.f32 %v431_v52, %v355_v8  ;;  %v448_v10 = vsub.f32 %v432_v53, %v362_v15  ;;  %v242_v6 = vsel %vm185_vm0, %v692_v1, 0.0 }
  0x33   : > { %v475_v16 = vsel %vm474_vm1, %v443_v60, %v442_v3  ;;  %v243_v22 = vrot.slane %v242_v6, 4  ;;  %v249_v23 = vsel %vm185_vm0, %v699_v19, 0.0  ;;  %v256_v24 = vsel %vm185_vm0, %v702_v56, 0.0 }
  0x34   : > { %v449_v25 = vsub.f32 %v433_v54, %v369_v4  ;;  %v477_v26 = vsel %vm476_vm2, %v444_v20, %v475_v16  ;;  %v250_v28 = vrot.slane %v249_v23, 4  ;;  %v257_v29 = vrot.slane %v256_v24, 4 }
  0x35   : > { %v479_v30 = vsel %vm478_vm3, %v445_v21, %v477_v26  ;;  %v244_v31 = vadd.f32 %v243_v22, %v242_v6  ;;  %v263_v32 = vsel %vm185_vm0, %v705_v11, 0.0  ;;  %v270_v33 = vsel %vm185_vm0, %v708_v9, 0.0 }
  0x36   : > { %v481_v34 = vsel %vm480_vm4, %v446_v0, %v479_v30  ;;  %v251_v35 = vadd.f32 %v250_v28, %v249_v23  ;;  %v258_v36 = vadd.f32 %v257_v29, %v256_v24  ;;  %v264_v37 = vrot.slane %v263_v32, 4 }
  0x37   : > { %v483_v38 = vsel %vm482_vm5, %v447_v5, %v481_v34  ;;  %v245_v39 = vrot.slane %v244_v31, 2  ;;  %v271_v40 = vrot.slane %v270_v33, 4  ;;  %v277_v41 = vsel %vm185_vm0, %v182_v27, 0.0 }
  0x38   : > { %v485_v42 = vsel %vm484_vm6, %v448_v10, %v483_v38  ;;  %v252_v44 = vrot.slane %v251_v35, 2  ;;  %v259_v45 = vrot.slane %v258_v36, 2  ;;  %v265_v46 = vadd.f32 %v264_v37, %v263_v32 }
  0x39   : > { %v487_v47 = vsel %vm486_vm7, %v449_v25, %v485_v42  ;;  %v246_v48 = vadd.f32 %v245_v39, %v244_v31  ;;  %v272_v49 = vadd.f32 %v271_v40, %v270_v33  ;;  %v278_v50 = vrot.slane %v277_v41, 4 }
  0x3a   : > { %v497_v51 = vsel %vm185_vm0, %v487_v47, 0.0  ;;  %v253_v57 = vadd.f32 %v252_v44, %v251_v35  ;;  %v260_v58 = vadd.f32 %v259_v45, %v258_v36  ;;  %v266_v59 = vrot.slane %v265_v46, 2 }
  0x3b   : > { %498 = vadd.xlane.f32.xlu0 %v497_v51  ;;  %v247_v61 = vrot.slane %v246_v48, 1  ;;  %v273_v62 = vrot.slane %v272_v49, 2  ;;  %v279_v63 = vadd.f32 %v278_v50, %v277_v41  ;;  %v284_v7 = vsel %vm185_vm0, %v183_v43, 0.0 }
  0x3c   : > { %v254_v8 = vrot.slane %v253_v57, 1  ;;  %v261_v12 = vrot.slane %v260_v58, 1  ;;  %v267_v13 = vadd.f32 %v266_v59, %v265_v46  ;;  %v285_v14 = vrot.slane %v284_v7, 4 }
  0x3d   : > { %v733_v15 = vadd.f32 %v247_v61, %v246_v48  ;;  %v274_v17 = vadd.f32 %v273_v62, %v272_v49  ;;  %v280_v18 = vrot.slane %v279_v63, 2  ;;  %v291_v52 = vsel %vm185_vm0, %v184_v55, 0.0 }
  0x3e   : > { %v736_v2 = vadd.f32 %v254_v8, %v253_v57  ;;  %v738_v53 = vadd.f32 %v261_v12, %v260_v58  ;;  %v268_v54 = vrot.slane %v267_v13, 1  ;;  %v286_v3 = vadd.f32 %v285_v14, %v284_v7 }
  0x3f   : > { %v275_v60 = vrot.slane %v274_v17, 1  ;;  %v281_v20 = vadd.f32 %v280_v18, %v279_v63  ;;  %v292_v21 = vrot.slane %v291_v52, 4  ;;  %v306_v0 = vmul.f32 %v692_v1, %v692_v1 }
  0x40   : > { %v742_v4 = vadd.f32 %v268_v54, %v267_v13  ;;  %v287_v5 = vrot.slane %v286_v3, 2  ;;  %v307_v10 = vmul.f32 %v699_v19, %v699_v19  ;;  %v308_v6 = vmul.f32 %v702_v56, %v702_v56 }
  0x41   : > { %v748_v16 = vadd.f32 %v275_v60, %v274_v17  ;;  %v282_v22 = vrot.slane %v281_v20, 1  ;;  %v293_v23 = vadd.f32 %v292_v21, %v291_v52  ;;  %v309_v24 = vmul.f32 %v705_v11, %v705_v11 }
  0x42   : > { %v288_v25 = vadd.f32 %v287_v5, %v286_v3  ;;  %v310_v1 = vmul.f32 %v708_v9, %v708_v9  ;;  %v311_v26 = vmul.f32 %v182_v27, %v182_v27  ;;  %v312_v28 = vmul.f32 %v183_v43, %v183_v43 }
  0x43   : > { %v754_v29 = vadd.f32 %v282_v22, %v281_v20  ;;  %v294_v30 = vrot.slane %v293_v23, 2  ;;  %v313_v19 = vmul.f32 %v184_v55, %v184_v55  ;;  %v370_v31 = vsel %vm185_vm0, %v306_v0, 0.0 }
  0x44   : > { %v289_v56 = vrot.slane %v288_v25, 1  ;;  %v371_v32 = vrot.slane %v370_v31, 4  ;;  %v377_v33 = vsel %vm185_vm0, %v307_v10, 0.0  ;;  %v384_v34 = vsel %vm185_vm0, %v308_v6, 0.0 }
  0x45   : > { %v295_v35 = vadd.f32 %v294_v30, %v293_v23  ;;  %v378_v11 = vrot.slane %v377_v33, 4  ;;  %v385_v36 = vrot.slane %v384_v34, 4  ;;  %v391_v37 = vsel %vm185_vm0, %v309_v24, 0.0 }
  0x46   : > { %v290_v9 = vadd.f32 %v289_v56, %v288_v25  ;;  %v372_v27 = vadd.f32 %v371_v32, %v370_v31  ;;  %v392_v38 = vrot.slane %v391_v37, 4  ;;  %v398_v39 = vsel %vm185_vm0, %v310_v1, 0.0 }
  0x47   : > { %v296_v40 = vrot.slane %v295_v35, 1  ;;  %v379_v41 = vadd.f32 %v378_v11, %v377_v33  ;;  %v386_v42 = vadd.f32 %v385_v36, %v384_v34  ;;  %v399_v43 = vrot.slane %v398_v39, 4 }
  0x48   : > { %v373_v44 = vrot.slane %v372_v27, 2  ;;  %v393_v45 = vadd.f32 %v392_v38, %v391_v37  ;;  %v405_v46 = vsel %vm185_vm0, %v311_v26, 0.0  ;;  %v412_v47 = vsel %vm185_vm0, %v312_v28, 0.0 }
  0x49   : > { %v297_v48 = vadd.f32 %v296_v40, %v295_v35  ;;  %v380_v49 = vrot.slane %v379_v41, 2  ;;  %v387_v50 = vrot.slane %v386_v42, 2  ;;  %v400_v51 = vadd.f32 %v399_v43, %v398_v39 }
  0x4a   : > { %v374_v55 = vadd.f32 %v373_v44, %v372_v27  ;;  %v394_v57 = vrot.slane %v393_v45, 2  ;;  %v406_v58 = vrot.slane %v405_v46, 4  ;;  %v413_v59 = vrot.slane %v412_v47, 4 }
  0x4b   : > { %v381_v61 = vadd.f32 %v380_v49, %v379_v41  ;;  %v388_v62 = vadd.f32 %v387_v50, %v386_v42  ;;  %v401_v63 = vrot.slane %v400_v51, 2  ;;  %v419_v7 = vsel %vm185_vm0, %v313_v19, 0.0  ;;  %v505_v49 = vld [vmem:[%s161_s20] sm:$0xff] }
  0x4c   : > { %v375_v8 = vrot.slane %v374_v55, 1  ;;  %v395_v12 = vadd.f32 %v394_v57, %v393_v45  ;;  %v407_v13 = vadd.f32 %v406_v58, %v405_v46  ;;  %v414_v14 = vadd.f32 %v413_v59, %v412_v47  ;;  %v506_v57 = vld [vmem:[%s161_s20 + $0x8] sm:$0xff] }
  0x4d   : > { %v382_v17 = vrot.slane %v381_v61, 1  ;;  %v389_v18 = vrot.slane %v388_v62, 1  ;;  %v402_v52 = vadd.f32 %v401_v63, %v400_v51  ;;  %v420_v54 = vrot.slane %v419_v7, 4 }
  0x4e   : > { %v376_v3 = vadd.f32 %v375_v8, %v374_v55  ;;  %v396_v60 = vrot.slane %v395_v12, 1  ;;  %v408_v20 = vrot.slane %v407_v13, 2  ;;  %v415_v21 = vrot.slane %v414_v14, 2 }
  0x4f   : > { %v383_v0 = vadd.f32 %v382_v17, %v381_v61  ;;  %v390_v5 = vadd.f32 %v389_v18, %v388_v62  ;;  %v403_v10 = vrot.slane %v402_v52, 1  ;;  %v421_v6 = vadd.f32 %v420_v54, %v419_v7 }
  0x50   : > { %v397_v22 = vadd.f32 %v396_v60, %v395_v12  ;;  %v409_v23 = vadd.f32 %v408_v20, %v407_v13  ;;  %v416_v24 = vadd.f32 %v415_v21, %v414_v14  ;;  %v434_v25 = vmul.f32 %v733_v15, %v733_v15 }
  0x51   : > { %v404_v1 = vadd.f32 %v403_v10, %v402_v52  ;;  %v422_v26 = vrot.slane %v421_v6, 2  ;;  %v435_v28 = vmul.f32 %v736_v2, %v736_v2  ;;  %v436_v30 = vmul.f32 %v738_v53, %v738_v53 }
  0x52   : > { %v410_v19 = vrot.slane %v409_v23, 1  ;;  %v417_v31 = vrot.slane %v416_v24, 1  ;;  %v437_v56 = vmul.f32 %v742_v4, %v742_v4  ;;  %v438_v32 = vmul.f32 %v748_v16, %v748_v16 }
  0x53   : > { %v423_v33 = vadd.f32 %v422_v26, %v421_v6  ;;  %v439_v15 = vmul.f32 %v754_v29, %v754_v29  ;;  %v440_v34 = vmul.f32 %v290_v9, %v290_v9  ;;  %v441_v35 = vmul.f32 %v297_v48, %v297_v48 }
  0x54   : > { %v411_v11 = vadd.f32 %v410_v19, %v409_v23  ;;  %v418_v36 = vadd.f32 %v417_v31, %v416_v24  ;;  %v450_v2 = vsub.f32 %v434_v25, %v376_v3  ;;  %v451_v37 = vsub.f32 %v435_v28, %v383_v0 }
  0x55   : > { %v424_v27 = vrot.slane %v423_v33, 1  ;;  %v452_v53 = vsub.f32 %v436_v30, %v390_v5  ;;  %v453_v38 = vsub.f32 %v437_v56, %v397_v22  ;;  %v454_v39 = vsub.f32 %v438_v32, %v404_v1 }
  0x56   : > { %v455_v40 = vsub.f32 %v439_v15, %v411_v11  ;;  %v488_v4 = vsel %vm474_vm1, %v451_v37, %v450_v2  ;;  %v456_v16 = vsub.f32 %v440_v34, %v418_v36 }
  0x57   : > { %v425_v41 = vadd.f32 %v424_v27, %v423_v33  ;;  %v489_v42 = vsel %vm476_vm2, %v452_v53, %v488_v4 }
  0x58   : > { %v490_v29 = vsel %vm478_vm3, %v453_v38, %v489_v42 }
  0x59   : > { %v457_v9 = vsub.f32 %v441_v35, %v425_v41  ;;  %v491_v43 = vsel %vm480_vm4, %v454_v39, %v490_v29 }
  0x5a   : > { %v492_v44 = vsel %vm482_vm5, %v455_v40, %v491_v43 }
  0x5b   : > { %v493_v45 = vsel %vm484_vm6, %v456_v16, %v492_v44 }
  0x5c   : > { %v494_v46 = vsel %vm486_vm7, %v457_v9, %v493_v45 }
  0x5d   : > { %v500_v47 = vsel %vm185_vm0, %v494_v46, 0.0 }
  0x5e   : > { %501 = vadd.xlane.f32.xlu0 %v500_v47 }
  0xc8   : > { %v499_v48 = vpop.xlane.xlu0 %498 }
  0xc9   : > { %v503_v50 = vmul.f32 0.5, %v499_v48 }
  0xcb   : > { %v507_v51 = vadd.f32 %v505_v49, %v503_v50 }
  0xcd   : > { %510 = vst.msk [vmem:[%s167_s23] sm:$0xff] %vm509_vm8, %v507_v51 }
  0xeb   : > { %v502_v55 = vpop.xlane.xlu0 %501 }
  0xec   : > { %v504_v58 = vmul.f32 0.5, %v502_v55 }
  0xee   : > { %v508_v59 = vadd.f32 %v506_v57, %v504_v58 }
  0xf0   : > { %511 = vst.msk [vmem:[%s167_s23 + $0x8] sm:$0xff] %vm509_vm8, %v508_v59 }
  0xf1 PF: > { %s12_s9 = sadd.s32 1, %s607_s9  }
  0xf2   : > { %p9_p5 = scmp.ge.s32.totalorder %s12_s9, 6  }
  0xf4   :  { %11 = sbr.rel (!%p9_p5) target bundleno = 1 (0x1), region = 61 }

</bundles_post_ra>
